<compile_context>
chip_gen: v6e
topology: v6e:2x2x1
jax: 0.10.0
libtpu: 0.0.40
codegen_flags: <defaults>
</compile_context>

<pallas_src>
import functools

import jax
import jax.numpy as jnp
from jax import lax
from jax.experimental import pallas as pl
from jax.experimental.pallas import tpu as pltpu


_PAD_LOGIT = -1.0e4  # sigmoid -> 0 and BCE elem -> 0 exactly; finite in bf16/f16.


# --------------------------------------------------------------------------- #
# Kernel                                                                      #
# --------------------------------------------------------------------------- #
def _bce_dice_partial_kernel(x_ref, t_ref, out_ref, *,
                             tile_rows, rows_valid, steps_per_chunk,
                             approx_sigmoid):
    """Grid: (parallel chunk p, reduction step j). Accumulates per-chunk
    partial sums directly into the resident output block (1, 4, n, 8, 128)."""
    p = pl.program_id(0)
    j = pl.program_id(1)

    @pl.when(j == 0)
    def _():
        out_ref[...] = jnp.zeros_like(out_ref)

    x = x_ref[...].astype(jnp.float32)   # (n, TR, 128) logits
    t = t_ref[...].astype(jnp.float32)   # (n, TR, 128) 0/1 targets

    # Tail mask: rows whose *logical* global index is past the real data
    # (overhanging last block, or duplicate clamped blocks) contribute 0.
    # Must be applied before exp/log/divide (overhang may contain garbage).
    gstart = (p * steps_per_chunk + j) * tile_rows
    row_ids = lax.broadcasted_iota(jnp.int32, (1, tile_rows, 128), 1) + gstart
    valid = row_ids < rows_valid
    x = jnp.where(valid, x, _PAD_LOGIT)
    t = jnp.where(valid, t, 0.0)

    # Shared transcendental: e = exp(-|x|) feeds both BCE and sigmoid.
    e = jnp.exp(-jnp.abs(x))
    d = 1.0 + e
    # Numerically stable BCE with logits: max(x, 0) - x*t + log(1 + exp(-|x|))
    bce_elem = jnp.maximum(x, 0.0) - x * t + jnp.log(d)
    # sigmoid(x) = where(x >= 0, 1, e) / (1 + e)
    if approx_sigmoid:
        r = pl.reciprocal(d, approx=True)     # EUP vrcp, ~1e-4 rel error
    else:
        r = 1.0 / d
    s = jnp.where(x >= 0.0, r, e * r)

    n, tr, _ = x.shape

    def fold(v):
        # Full-vreg VALU accumulation: keep the 8-sublane axis, defer the
        # final (8,128) reduce to the tiny JAX combine outside the kernel.
        return jnp.sum(v.reshape(n, tr // 8, 8, 128), axis=1)   # (n, 8, 128)

    out_ref[0, 0] += fold(bce_elem)
    out_ref[0, 1] += fold(s * t)
    out_ref[0, 2] += fold(s)
    out_ref[0, 3] += fold(t)


# --------------------------------------------------------------------------- #
# Hardware queries (best-effort, safe fallbacks)                              #
# --------------------------------------------------------------------------- #
def _tpu_info():
    try:
        return pltpu.get_tpu_info()
    except Exception:
        return None


def _vmem_capacity_bytes():
    info = _tpu_info()
    if info is not None:
        v = getattr(info, "vmem_capacity_bytes", None)
        if isinstance(v, int) and v > 0:
            return v
    return 64 * 1024 * 1024   # conservative (v7x-sized) default


def _tensorcore_count():
    info = _tpu_info()
    if info is not None:
        for name in ("num_cores", "core_count", "num_tensorcores",
                     "tensorcore_count", "num_tensor_cores"):
            v = getattr(info, name, None)
            if isinstance(v, int) and 1 <= v <= 8:
                return v
    return 1                  # safe default: no wasted padded chunk on 1-TC chips


# --------------------------------------------------------------------------- #
# Wrapper                                                                     #
# --------------------------------------------------------------------------- #
def bce_dice_loss(logits, target, *, approx_sigmoid=True):
    """logits, target: (N, ...) arrays (e.g. NCHW). Returns scalar float32 loss."""
    n = logits.shape[0]
    f = 1
    for dim in logits.shape[1:]:
        f *= dim

    x = logits.reshape(n, f)
    t = target.reshape(n, f)

    # --- lane-dense layout ----------------------------------------------------
    # Pad only the lane remainder (f % 128) and, for tiny F, up to one full
    # (8,128) group. Row/tile rounding is handled by block overhang + mask.
    f128 = -(-f // 128) * 128
    if f128 < 8 * 128:
        f128 = 8 * 128
    if f128 != f:
        # Padded elements contribute exactly 0 to the BCE sum and every dice sum.
        x = jnp.pad(x, ((0, 0), (0, f128 - f)), constant_values=_PAD_LOGIT)
        t = jnp.pad(t, ((0, 0), (0, f128 - f)), constant_values=0)
    rows = f128 // 128
    x = x.reshape(n, rows, 128)
    t = t.reshape(n, rows, 128)

    # --- tile sizing ------------------------------------------------------------
    cores = _tensorcore_count()
    vmem_cap = _vmem_capacity_bytes()

    in_bytes_per_row = n * 128 * (x.dtype.itemsize + t.dtype.itemsize)
    target_block_bytes = min(4 * 1024 * 1024, vmem_cap // 16)
    rows_floor8 = (rows // 8) * 8                                   # >= 8
    tile_rows = max(8, (target_block_bytes // in_bytes_per_row) // 8 * 8)
    tile_rows = min(tile_rows, rows_floor8)

    # Keep >= 3 reduction steps per TensorCore so prefetch of j+1 overlaps
    # compute of j, but never shrink blocks below 256 rows.
    cap = (rows // (3 * max(cores, 1))) // 8 * 8
    if cap >= 256:
        tile_rows = min(tile_rows, cap)

    steps_total = -(-rows // tile_rows)
    num_parallel = cores if (cores > 1 and steps_total >= 2 * cores) else 1
    steps_per_chunk = -(-steps_total // num_parallel)
    last_block = steps_total - 1

    def in_index_map(p, j):
        lb = p * steps_per_chunk + j
        # Clamp so no block starts fully out of bounds; duplicates are masked
        # to zero contribution inside the kernel.
        return (0, jnp.minimum(lb, last_block), 0)

    # --- VMEM budget ------------------------------------------------------------
    in_block_bytes = n * tile_rows * 128 * (x.dtype.itemsize + t.dtype.itemsize)
    f32_tile_bytes = n * tile_rows * 128 * 4
    out_bytes = num_parallel * 4 * n * 8 * 128 * 4
    vmem_limit = 2 * in_block_bytes + 8 * f32_tile_bytes + out_bytes + (2 << 20)
    vmem_limit = max(32 * 1024 * 1024, vmem_limit)
    vmem_limit = min(vmem_limit, vmem_cap, 128 * 1024 * 1024)

    cost = pl.CostEstimate(
        flops=14 * n * f128,
        transcendentals=3 * n * f128,
        bytes_accessed=n * f128 * (x.dtype.itemsize + t.dtype.itemsize) + out_bytes,
    )

    kernel = functools.partial(
        _bce_dice_partial_kernel,
        tile_rows=tile_rows,
        rows_valid=rows,
        steps_per_chunk=steps_per_chunk,
        approx_sigmoid=approx_sigmoid,
    )

    partials = pl.pallas_call(
        kernel,
        out_shape=jax.ShapeDtypeStruct((num_parallel, 4, n, 8, 128), jnp.float32),
        grid_spec=pltpu.PrefetchScalarGridSpec(
            num_scalar_prefetch=0,
            grid=(num_parallel, steps_per_chunk),
            in_specs=[
                pl.BlockSpec((n, tile_rows, 128), in_index_map),
                pl.BlockSpec((n, tile_rows, 128), in_index_map),
            ],
            out_specs=pl.BlockSpec((1, 4, n, 8, 128),
                                   lambda p, j: (p, 0, 0, 0, 0)),
        ),
        compiler_params=pltpu.CompilerParams(
            dimension_semantics=("parallel", "arbitrary"),
            vmem_limit_bytes=int(vmem_limit),
        ),
        cost_estimate=cost,
    )(x, t)

    # Tiny final combine (a few KiB of partials) in plain JAX.
    bce_sum = jnp.sum(partials[:, 0])
    inter = jnp.sum(partials[:, 1], axis=(0, 2, 3))
    inp_sum = jnp.sum(partials[:, 2], axis=(0, 2, 3))
    tgt_sum = jnp.sum(partials[:, 3], axis=(0, 2, 3))

    smooth = 1e-05
    bce_mean = bce_sum / (n * f)
    dice = (2.0 * inter + smooth) / (inp_sum + tgt_sum + smooth)
    dice_loss = 1.0 - jnp.sum(dice) / n
    return 0.5 * bce_mean + dice_loss


# --------------------------------------------------------------------------- #
# Reference + self-test                                                       #
# --------------------------------------------------------------------------- #
def _reference(logits, target):
    """Pure-JAX reference mirroring the PyTorch forward."""
    x = logits.astype(jnp.float32)
    t = target.astype(jnp.float32)
    bce = jnp.mean(jnp.maximum(x, 0.0) - x * t + jnp.log1p(jnp.exp(-jnp.abs(x))))
    smooth = 1e-05
    n = x.shape[0]
    s = jax.nn.sigmoid(x).reshape(n, -1)
    tt = t.reshape(n, -1)
    inter = jnp.sum(s * tt, axis=1)
    dice = (2.0 * inter + smooth) / (jnp.sum(s, axis=1) + jnp.sum(tt, axis=1) + smooth)
    dice = 1.0 - jnp.sum(dice) / n
    return 0.5 * bce + dice


if __name__ == "__main__":
    key = jax.random.PRNGKey(0)
    k1, k2 = jax.random.split(key)
    # Shapes consistent with a U-Net++ segmentation head: (N, C, H, W)
    logits = jax.random.normal(k1, (2, 4, 16, 16), dtype=jnp.float32)
    target = (jax.random.uniform(k2, (2, 4, 16, 16)) > 0.5).astype(jnp.float32)

    loss = jax.block_until_ready(bce_dice_loss(logits, target))
    ref = jax.block_until_ready(_reference(logits, target))

    # approx reciprocal in the sigmoid gives ~1e-4 relative error on the dice
    # term; use a slightly loosened tolerance accordingly.
    assert jnp.allclose(loss, ref, rtol=2e-3, atol=2e-3), (loss, ref)
    print("KERNEL_OK")
</pallas_src>

<mosaic_0001>
module attributes {stable_mosaic.version = 11 : i64} {
  func.func @_bce_dice_partial_kernel(%arg0: i32, %arg1: i32, %arg2: memref<2x8x128xf32, #tpu.memory_space<vmem>>, %arg3: memref<2x8x128xf32, #tpu.memory_space<vmem>>, %arg4: memref<1x4x2x8x128xf32, #tpu.memory_space<vmem>>) attributes {dimension_semantics = [#tpu.dimension_semantics<parallel>, #tpu.dimension_semantics<arbitrary>], iteration_bounds = array<i64: 1, 1>, scalar_prefetch = 0 : i64, scratch_operands = 0 : i64, tpu.core_type = #tpu.core_type<tc>, window_params = [{transform_indices = @transform_0, window_bounds = array<i64: 2, 8, 128>}, {transform_indices = @transform_1, window_bounds = array<i64: 2, 8, 128>}, {transform_indices = @transform_2, window_bounds = array<i64: 1, 4, 2, 8, 128>}]} {
    %c0_i32 = arith.constant 0 : i32
    %0 = arith.cmpi eq, %arg1, %c0_i32 : i32
    %1 = arith.extui %0 : i1 to i32
    %c0_i32_0 = arith.constant 0 : i32
    %2 = arith.cmpi ne, %1, %c0_i32_0 : i32
    scf.if %2 {
      %cst_53 = arith.constant 0.000000e+00 : f32
      %71 = vector.broadcast %cst_53 : f32 to vector<1x4x2x8x128xf32>
      %c0_54 = arith.constant 0 : index
      %c0_55 = arith.constant 0 : index
      %c0_56 = arith.constant 0 : index
      %c0_57 = arith.constant 0 : index
      %c0_58 = arith.constant 0 : index
      %72 = vector.load %arg4[%c0_54, %c0_55, %c0_56, %c0_57, %c0_58] : memref<1x4x2x8x128xf32, #tpu.memory_space<vmem>>, vector<1x4x2x8x128xf32>
      tpu.vector_store %arg4[%c0_54, %c0_55, %c0_56, %c0_57, %c0_58], %71 {strides = array<i32>} : memref<1x4x2x8x128xf32, #tpu.memory_space<vmem>>, vector<1x4x2x8x128xf32>,
    } else {
    }
    %c0 = arith.constant 0 : index
    %c0_1 = arith.constant 0 : index
    %c0_2 = arith.constant 0 : index
    %3 = vector.load %arg2[%c0, %c0_1, %c0_2] : memref<2x8x128xf32, #tpu.memory_space<vmem>>, vector<2x8x128xf32>
    %c0_3 = arith.constant 0 : index
    %c0_4 = arith.constant 0 : index
    %c0_5 = arith.constant 0 : index
    %4 = vector.load %arg3[%c0_3, %c0_4, %c0_5] : memref<2x8x128xf32, #tpu.memory_space<vmem>>, vector<2x8x128xf32>
    %c1_i32 = arith.constant 1 : i32
    %5 = arith.muli %arg0, %c1_i32 : i32
    %6 = arith.addi %5, %arg1 : i32
    %c8_i32 = arith.constant 8 : i32
    %7 = arith.muli %6, %c8_i32 : i32
    %8 = tpu.iota {dimensions = array<i32: 1>} : vector<1x8x128xi32>
    %9 = vector.broadcast %7 : i32 to vector<1x8x128xi32>
    %10 = arith.addi %8, %9 : vector<1x8x128xi32>
    %c8_i32_6 = arith.constant 8 : i32
    %11 = vector.broadcast %c8_i32_6 : i32 to vector<1x8x128xi32>
    %12 = arith.cmpi slt, %10, %11 : vector<1x8x128xi32>
    %cst = arith.constant -1.000000e+04 : f32
    %13 = vector.shape_cast %12 : vector<1x8x128xi1> to vector<1x8x128xi1>
    %14 = vector.broadcast %13 : vector<1x8x128xi1> to vector<2x8x128xi1>
    %15 = vector.broadcast %cst : f32 to vector<2x8x128xf32>
    %16 = arith.select %14, %3, %15 : vector<2x8x128xi1>, vector<2x8x128xf32>
    %cst_7 = arith.constant 0.000000e+00 : f32
    %17 = vector.shape_cast %12 : vector<1x8x128xi1> to vector<1x8x128xi1>
    %18 = vector.broadcast %17 : vector<1x8x128xi1> to vector<2x8x128xi1>
    %19 = vector.broadcast %cst_7 : f32 to vector<2x8x128xf32>
    %20 = arith.select %18, %4, %19 : vector<2x8x128xi1>, vector<2x8x128xf32>
    %21 = math.absf %16 : vector<2x8x128xf32>
    %cst_8 = arith.constant 0.000000e+00 : f32
    %22 = vector.broadcast %cst_8 : f32 to vector<2x8x128xf32>
    %23 = arith.subf %22, %21 : vector<2x8x128xf32>
    %24 = math.exp %23 : vector<2x8x128xf32>
    %cst_9 = arith.constant 1.000000e+00 : f32
    %25 = vector.broadcast %cst_9 : f32 to vector<2x8x128xf32>
    %26 = arith.addf %25, %24 : vector<2x8x128xf32>
    %cst_10 = arith.constant 0.000000e+00 : f32
    %27 = vector.broadcast %cst_10 : f32 to vector<2x8x128xf32>
    %28 = arith.maximumf %16, %27 : vector<2x8x128xf32>
    %29 = arith.mulf %16, %20 : vector<2x8x128xf32>
    %30 = arith.subf %28, %29 : vector<2x8x128xf32>
    %31 = math.log %26 : vector<2x8x128xf32>
    %32 = arith.addf %30, %31 : vector<2x8x128xf32>
    %33 = tpu.reciprocal %26 {approx = true} : vector<2x8x128xf32> -> vector<2x8x128xf32>
    %cst_11 = arith.constant 0.000000e+00 : f32
    %34 = vector.broadcast %cst_11 : f32 to vector<2x8x128xf32>
    %35 = arith.cmpf oge, %16, %34 : vector<2x8x128xf32>
    %36 = arith.mulf %24, %33 : vector<2x8x128xf32>
    %37 = arith.select %35, %33, %36 : vector<2x8x128xi1>, vector<2x8x128xf32>
    %c0_12 = arith.constant 0 : index
    %c0_13 = arith.constant 0 : index
    %c0_14 = arith.constant 0 : index
    %c0_15 = arith.constant 0 : index
    %c0_16 = arith.constant 0 : index
    %38 = vector.load %arg4[%c0_12, %c0_13, %c0_14, %c0_15, %c0_16] : memref<1x4x2x8x128xf32, #tpu.memory_space<vmem>>, vector<1x1x2x8x128xf32>
    %39 = vector.shape_cast %38 : vector<1x1x2x8x128xf32> to vector<2x8x128xf32>
    %40 = vector.shape_cast %32 : vector<2x8x128xf32> to vector<2x1x8x128xf32>
    %cst_17 = arith.constant dense<0.000000e+00> : vector<2x8x128xf32>
    %41 = vector.multi_reduction <add>, %40, %cst_17 [1] : vector<2x1x8x128xf32> to vector<2x8x128xf32>
    %42 = arith.addf %39, %41 : vector<2x8x128xf32>
    %c0_18 = arith.constant 0 : index
    %c0_19 = arith.constant 0 : index
    %c0_20 = arith.constant 0 : index
    %c0_21 = arith.constant 0 : index
    %c0_22 = arith.constant 0 : index
    %43 = vector.load %arg4[%c0_18, %c0_19, %c0_20, %c0_21, %c0_22] : memref<1x4x2x8x128xf32, #tpu.memory_space<vmem>>, vector<1x1x2x8x128xf32>
    %44 = vector.shape_cast %43 : vector<1x1x2x8x128xf32> to vector<2x8x128xf32>
    %45 = vector.shape_cast %42 : vector<2x8x128xf32> to vector<1x1x2x8x128xf32>
    tpu.vector_store %arg4[%c0_18, %c0_19, %c0_20, %c0_21, %c0_22], %45 {strides = array<i32>} : memref<1x4x2x8x128xf32, #tpu.memory_space<vmem>>, vector<1x1x2x8x128xf32>,
    %c0_23 = arith.constant 0 : index
    %c1 = arith.constant 1 : index
    %c0_24 = arith.constant 0 : index
    %c0_25 = arith.constant 0 : index
    %c0_26 = arith.constant 0 : index
    %46 = vector.load %arg4[%c0_23, %c1, %c0_24, %c0_25, %c0_26] : memref<1x4x2x8x128xf32, #tpu.memory_space<vmem>>, vector<1x1x2x8x128xf32>
    %47 = vector.shape_cast %46 : vector<1x1x2x8x128xf32> to vector<2x8x128xf32>
    %48 = arith.mulf %37, %20 : vector<2x8x128xf32>
    %49 = vector.shape_cast %48 : vector<2x8x128xf32> to vector<2x1x8x128xf32>
    %cst_27 = arith.constant dense<0.000000e+00> : vector<2x8x128xf32>
    %50 = vector.multi_reduction <add>, %49, %cst_27 [1] : vector<2x1x8x128xf32> to vector<2x8x128xf32>
    %51 = arith.addf %47, %50 : vector<2x8x128xf32>
    %c0_28 = arith.constant 0 : index
    %c1_29 = arith.constant 1 : index
    %c0_30 = arith.constant 0 : index
    %c0_31 = arith.constant 0 : index
    %c0_32 = arith.constant 0 : index
    %52 = vector.load %arg4[%c0_28, %c1_29, %c0_30, %c0_31, %c0_32] : memref<1x4x2x8x128xf32, #tpu.memory_space<vmem>>, vector<1x1x2x8x128xf32>
    %53 = vector.shape_cast %52 : vector<1x1x2x8x128xf32> to vector<2x8x128xf32>
    %54 = vector.shape_cast %51 : vector<2x8x128xf32> to vector<1x1x2x8x128xf32>
    tpu.vector_store %arg4[%c0_28, %c1_29, %c0_30, %c0_31, %c0_32], %54 {strides = array<i32>} : memref<1x4x2x8x128xf32, #tpu.memory_space<vmem>>, vector<1x1x2x8x128xf32>,
    %c0_33 = arith.constant 0 : index
    %c2 = arith.constant 2 : index
    %c0_34 = arith.constant 0 : index
    %c0_35 = arith.constant 0 : index
    %c0_36 = arith.constant 0 : index
    %55 = vector.load %arg4[%c0_33, %c2, %c0_34, %c0_35, %c0_36] : memref<1x4x2x8x128xf32, #tpu.memory_space<vmem>>, vector<1x1x2x8x128xf32>
    %56 = vector.shape_cast %55 : vector<1x1x2x8x128xf32> to vector<2x8x128xf32>
    %57 = vector.shape_cast %37 : vector<2x8x128xf32> to vector<2x1x8x128xf32>
    %cst_37 = arith.constant dense<0.000000e+00> : vector<2x8x128xf32>
    %58 = vector.multi_reduction <add>, %57, %cst_37 [1] : vector<2x1x8x128xf32> to vector<2x8x128xf32>
    %59 = arith.addf %56, %58 : vector<2x8x128xf32>
    %c0_38 = arith.constant 0 : index
    %c2_39 = arith.constant 2 : index
    %c0_40 = arith.constant 0 : index
    %c0_41 = arith.constant 0 : index
    %c0_42 = arith.constant 0 : index
    %60 = vector.load %arg4[%c0_38, %c2_39, %c0_40, %c0_41, %c0_42] : memref<1x4x2x8x128xf32, #tpu.memory_space<vmem>>, vector<1x1x2x8x128xf32>
    %61 = vector.shape_cast %60 : vector<1x1x2x8x128xf32> to vector<2x8x128xf32>
    %62 = vector.shape_cast %59 : vector<2x8x128xf32> to vector<1x1x2x8x128xf32>
    tpu.vector_store %arg4[%c0_38, %c2_39, %c0_40, %c0_41, %c0_42], %62 {strides = array<i32>} : memref<1x4x2x8x128xf32, #tpu.memory_space<vmem>>, vector<1x1x2x8x128xf32>,
    %c0_43 = arith.constant 0 : index
    %c3 = arith.constant 3 : index
    %c0_44 = arith.constant 0 : index
    %c0_45 = arith.constant 0 : index
    %c0_46 = arith.constant 0 : index
    %63 = vector.load %arg4[%c0_43, %c3, %c0_44, %c0_45, %c0_46] : memref<1x4x2x8x128xf32, #tpu.memory_space<vmem>>, vector<1x1x2x8x128xf32>
    %64 = vector.shape_cast %63 : vector<1x1x2x8x128xf32> to vector<2x8x128xf32>
    %65 = vector.shape_cast %20 : vector<2x8x128xf32> to vector<2x1x8x128xf32>
    %cst_47 = arith.constant dense<0.000000e+00> : vector<2x8x128xf32>
    %66 = vector.multi_reduction <add>, %65, %cst_47 [1] : vector<2x1x8x128xf32> to vector<2x8x128xf32>
    %67 = arith.addf %64, %66 : vector<2x8x128xf32>
    %c0_48 = arith.constant 0 : index
    %c3_49 = arith.constant 3 : index
    %c0_50 = arith.constant 0 : index
    %c0_51 = arith.constant 0 : index
    %c0_52 = arith.constant 0 : index
    %68 = vector.load %arg4[%c0_48, %c3_49, %c0_50, %c0_51, %c0_52] : memref<1x4x2x8x128xf32, #tpu.memory_space<vmem>>, vector<1x1x2x8x128xf32>
    %69 = vector.shape_cast %68 : vector<1x1x2x8x128xf32> to vector<2x8x128xf32>
    %70 = vector.shape_cast %67 : vector<2x8x128xf32> to vector<1x1x2x8x128xf32>
    tpu.vector_store %arg4[%c0_48, %c3_49, %c0_50, %c0_51, %c0_52], %70 {strides = array<i32>} : memref<1x4x2x8x128xf32, #tpu.memory_space<vmem>>, vector<1x1x2x8x128xf32>,
    return
  }
  func.func @transform_0(%arg0: i32, %arg1: i32) -> (i32, i32, i32) {
    %c1_i32 = arith.constant 1 : i32
    %0 = arith.muli %arg0, %c1_i32 : i32
    %1 = arith.addi %0, %arg1 : i32
    %c0_i32 = arith.constant 0 : i32
    %2 = arith.minsi %1, %c0_i32 : i32
    %c0_i32_0 = arith.constant 0 : i32
    %c0_i32_1 = arith.constant 0 : i32
    %c0_i32_2 = arith.constant 0 : i32
    return %c0_i32_0, %2, %c0_i32_1 : i32, i32, i32
  }
  func.func @transform_1(%arg0: i32, %arg1: i32) -> (i32, i32, i32) {
    %c1_i32 = arith.constant 1 : i32
    %0 = arith.muli %arg0, %c1_i32 : i32
    %1 = arith.addi %0, %arg1 : i32
    %c0_i32 = arith.constant 0 : i32
    %2 = arith.minsi %1, %c0_i32 : i32
    %c0_i32_0 = arith.constant 0 : i32
    %c0_i32_1 = arith.constant 0 : i32
    %c0_i32_2 = arith.constant 0 : i32
    return %c0_i32_0, %2, %c0_i32_1 : i32, i32, i32
  }
  func.func @transform_2(%arg0: i32, %arg1: i32) -> (i32, i32, i32, i32, i32) {
    %c0_i32 = arith.constant 0 : i32
    %c0_i32_0 = arith.constant 0 : i32
    %c0_i32_1 = arith.constant 0 : i32
    %c0_i32_2 = arith.constant 0 : i32
    %c0_i32_3 = arith.constant 0 : i32
    return %arg0, %c0_i32, %c0_i32_0, %c0_i32_1, %c0_i32_2 : i32, i32, i32, i32, i32
  }
}

</mosaic_0001>

<bundles_post_ra>
// kernel: tpu_custom_call.1
= control target key start
LH: loop header
LB: loop body
LE: loop exit
PB: predicated region body
PF: predicated region fallthrough
CT: control target
= control target key end

     0   :  { %7 = vsyncpa [#allocation3], 0  ;;  %s296_s0 = inlined_call_operand.hbm [shape: f32[2,8,128], index: 0, kind: input, shape index: {}]   ;;  %s297_s1 = inlined_call_operand.hbm [shape: f32[2,8,128], index: 1, kind: input, shape index: {}]   ;;  %s298_s2 = inlined_call_operand.hbm [shape: f32[1,4,2,8,128], index: 2, kind: output, shape index: {}]  }
   0x1   :  { %8 = vsyncpa [#allocation6], 0 }
   0x2   :  { %9 = vsyncpa [#allocation4], 0  ;;  %s258_s9 = smov [#allocation2]  }
   0x3   :  { %s20_s10 = sshll.u32 %s258_s9, 4  ;;  %s21_s10 = int_to_ptr.vmem [resolvable:$true] %s20_s10 }
   0x4   :  { %s200_s11 = scalar_lea.vmem %s21_s10, 256  ;;  %p205_p1 = scmp.lt.s32.totalorder %s21_s10, %s21_s10 }
   0x5   :  { %p201_p0 = scmp.ne.s32.totalorder %s21_s10, %s200_s11  ;;  %p206_p2 = scmp.lt.s32.totalorder %s200_s11, %s200_s11 }
   0x7   :  { %p207_p3 = por %p206_p2, %p205_p1 }
   0x9   :  { %p208_p4 = pnand %p207_p3, %p201_p0 }
   0xb   :  { %211 = shalt.err (!%p208_p4)
}
   0xc   :  { %s259_s12 = smov 128   ;;  %s260_s13 = smov 8  }
   0xd   :  { %26 = dma.hbm_to_vmem [thread:$0]  %s296_s0, 256, %s21_s10, [#allocation3], %s259_s12, %s259_s12, %s260_s13  }
   0xe   :  { %s261_s16 = smov [#allocation5]  }
   0xf   :  { %s37_s17 = sshll.u32 %s261_s16, 4  ;;  %s38_s17 = int_to_ptr.vmem [resolvable:$true] %s37_s17 }
  0x10   :  { %s220_s18 = scalar_lea.vmem %s38_s17, 256  ;;  %p225_p6 = scmp.lt.s32.totalorder %s38_s17, %s38_s17 }
  0x11   :  { %p221_p5 = scmp.ne.s32.totalorder %s38_s17, %s220_s18  ;;  %p226_p7 = scmp.lt.s32.totalorder %s220_s18, %s220_s18 }
  0x13   :  { %p227_p8 = por %p226_p7, %p225_p6 }
  0x15   :  { %p228_p9 = pnand %p227_p8, %p221_p5 }
  0x17   :  { %231 = shalt.err (!%p228_p9)
}
  0x18   :  { %43 = dma.hbm_to_vmem [thread:$0]  %s297_s1, 256, %s38_s17, [#allocation6], %s259_s12, %s259_s12, %s260_s13  }
  0x19   :  { %252 = dma.done.wait [#allocation3], 256  }
  0x1a   :  { %253 = vsyncadd [#allocation3], 4294967040 }
  0x1b   :  { %254 = dma.done.wait [#allocation6], 256  }
  0x1c   :  { %255 = vsyncadd [#allocation6], 4294967040  ;;  %v68_v0 = vld [vmem:[#allocation2] sm:$0xff]  ;;  %v69_v1 = vld [vmem:[#allocation2 + $0x8] sm:$0xff]  ;;  %s262_s0 = smov [#allocation7]  }
  0x1d   :  { %v85_v2 = vand.u32 2147483647, %v68_v0  ;;  %v86_v3 = vand.u32 2147483647, %v69_v1  ;;  %v70_v4 = vld [vmem:[#allocation5] sm:$0xff]  ;;  %v71_v6 = vld [vmem:[#allocation5 + $0x8] sm:$0xff] }
  0x1e   :  { %150 = vst [vmem:[#allocation7 + $0x30] sm:$0xff] %v70_v4  ;;  %151 = vst [vmem:[#allocation7 + $0x38] sm:$0xff] %v71_v6  ;;  %v95_v14 = vmax.f32 %v68_v0, 0.0  ;;  %v97_v15 = vmul.f32 %v70_v4, %v68_v0  ;;  %v96_v16 = vmax.f32 %v69_v1, 0.0  ;;  %v98_v17 = vmul.f32 %v71_v6, %v69_v1  ;;  %s157_s1 = sshll.u32 %s262_s0, 4  ;;  %s158_s1 = int_to_ptr.vmem [resolvable:$true] %s157_s1 }
  0x1f   :  { %v87_v5 = vsub.f32 0.0, %v85_v2  ;;  %v88_v7 = vsub.f32 0.0, %v86_v3  ;;  %vm109_vm0 = vcmp.ge.f32.partialorder %v68_v0, 0.0  ;;  %vm110_vm1 = vcmp.ge.f32.partialorder %v69_v1, 0.0  ;;  %s232_s21 = scalar_lea.vmem %s158_s1, 1024  ;;  %p237_p11 = scmp.lt.s32.totalorder %s158_s1, %s158_s1 }
  0x20   :  { %v99_v18 = vsub.f32 %v95_v14, %v97_v15  ;;  %v100_v22 = vsub.f32 %v96_v16, %v98_v17  ;;  %p233_p10 = scmp.ne.s32.totalorder %s158_s1, %s232_s21  ;;  %p238_p12 = scmp.lt.s32.totalorder %s232_s21, %s232_s21 }
  0x21   :  { %v89_v8 = vmul.f32 1.442695, %v87_v5  ;;  %v91_v9 = vmul.f32 1.442695, %v88_v7 }
  0x22   :  { %p239_p13 = por %p238_p12, %p237_p11 }
  0x23   :  { %180 = vpow2.f32 %v89_v8 }
  0x24   :  { %182 = vpow2.f32 %v91_v9  ;;  %p240_p0 = pnand %p239_p13, %p233_p10 }
  0x30   :  { %v181_v10 = vpop.eup %180 }
  0x31   :  { %v183_v11 = vpop.eup %182  ;;  %v93_v12 = vadd.f32 1.0, %v181_v10 }
  0x32   :  { %v94_v13 = vadd.f32 1.0, %v183_v11 }
  0x33   :  { %184 = vlog2.f32 %v93_v12 }
  0x34   :  { %186 = vrcp.f32 %v93_v12 }
  0x35   :  { %188 = vlog2.f32 %v94_v13 }
  0x36   :  { %190 = vrcp.f32 %v94_v13 }
  0x40   :  { %v185_v19 = vpop.eup %184 }
  0x41   :  { %v187_v20 = vpop.eup %186  ;;  %v102_v21 = vmul.f32 0.6931472, %v185_v19 }
  0x42   :  { %v189_v23 = vpop.eup %188  ;;  %v111_v24 = vmul.f32 %v187_v20, %v181_v10 }
  0x43   :  { %v191_v25 = vpop.eup %190  ;;  %v105_v26 = vadd.f32 %v102_v21, %v99_v18  ;;  %v104_v27 = vmul.f32 0.6931472, %v189_v23 }
  0x44   :  { %v113_v28 = vsel %vm109_vm0, %v187_v20, %v111_v24  ;;  %v112_v29 = vmul.f32 %v191_v25, %v183_v11 }
  0x45   :  { %v106_v30 = vadd.f32 %v104_v27, %v100_v22  ;;  %v126_v31 = vmul.f32 %v113_v28, %v70_v4  ;;  %121 = vst [vmem:[#allocation7] sm:$0xff] %v105_v26  ;;  %141 = vst [vmem:[#allocation7 + $0x20] sm:$0xff] %v113_v28 }
  0x46   :  { %v114_v32 = vsel %vm110_vm1, %v191_v25, %v112_v29 }
  0x47   :  { %v127_v33 = vmul.f32 %v114_v32, %v71_v6  ;;  %122 = vst [vmem:[#allocation7 + $0x8] sm:$0xff] %v106_v30  ;;  %132 = vst [vmem:[#allocation7 + $0x10] sm:$0xff] %v126_v31 }
  0x48   :  { %142 = vst [vmem:[#allocation7 + $0x28] sm:$0xff] %v114_v32 }
  0x49   :  { %133 = vst [vmem:[#allocation7 + $0x18] sm:$0xff] %v127_v33 }
  0x4a   :  { %243 = shalt.err (!%p240_p0)
}
  0x4b   :  { %163 = dma.vmem_to_hbm [thread:$0]  %s158_s1, 1024, %s298_s2, [#allocation4], %s259_s12, %s259_s12, %s260_s13  }
  0x4c   :  { %256 = dma.done.wait [#allocation4], 1024  }
  0x4d   :  { %257 = vsyncadd [#allocation4], 4294966272 }
  0x4e   :  { %167 = vsyncpa [#allocation3], 1 }
  0x4f   :  { %168 = vsyncpa [#allocation6], 1 }
  0x50   :  { %169 = vsyncpa [#allocation4], 1 }

</bundles_post_ra>
